<compile_context>
chip_gen: v7x
topology: tpu7x:2x2x1
jax: 0.10.0
libtpu: 0.0.40
codegen_flags: <defaults>
</compile_context>

<pallas_src>
import math
from functools import partial

import jax
import jax.numpy as jnp
from jax import lax
from jax.experimental import pallas as pl
from jax.experimental.pallas import tpu as pltpu


LN_EPS = 1e-5
BF16 = jnp.bfloat16
VMEM_LIMIT = 48 * 1024 * 1024   # > v5e 16MiB / v6e 32MiB defaults, < v7x 64MiB physical


def _layernorm_f32(x, g, b, eps):
    mu = jnp.mean(x, axis=-1, keepdims=True)
    var = jnp.mean(jnp.square(x - mu), axis=-1, keepdims=True)
    return (x - mu) * lax.rsqrt(var + eps) * g + b


def _gelu_tanh(x):
    # TODO(synk): nn.GELU() is exact (erf-based); tanh approximation is used here
    # since erf has no guaranteed Mosaic lowering (max abs deviation ~1e-3).
    c = math.sqrt(2.0 / math.pi)
    return 0.5 * x * (1.0 + jnp.tanh(c * (x + 0.044715 * x * x * x)))


# ---- kernel A: LN1 + QKV proj + multi-head attention + out proj + residual ----

def attn_block_kernel(x_ref, g1_ref, b1_ref, wqkv_ref, wproj_ref, bp_ref, o_ref,
                      ctx_ref, *, num_heads, head_dim, eps):
    H, D = num_heads, head_dim
    C = H * D

    x = x_ref[...].astype(jnp.float32)                         # (N, C)
    xn = _layernorm_f32(x, g1_ref[...], b1_ref[...], eps)

    # qkv = LN1(x) @ W_qkv^T  (W already transposed + scale-folded + bf16 in wrapper)
    qkv = jnp.dot(xn.astype(BF16), wqkv_ref[...],
                  preferred_element_type=jnp.float32)          # (N, 3C) f32

    # per-head attention; write each head's context into the VMEM scratch at
    # column h*D, then do ONE full-depth output projection afterwards.
    for h in range(H):                                         # static unroll
        q = qkv[:, h * D:(h + 1) * D]                          # scale folded into W_qkv
        k = qkv[:, C + h * D:C + (h + 1) * D]
        v = qkv[:, 2 * C + h * D:2 * C + (h + 1) * D]
        s = lax.dot_general(q.astype(BF16), k.astype(BF16),
                            (((1,), (1,)), ((), ())),
                            preferred_element_type=jnp.float32)  # (N, N)
        s = s - jnp.max(s, axis=-1, keepdims=True)
        p = jnp.exp(s)
        p = p / jnp.sum(p, axis=-1, keepdims=True)
        ctx_ref[:, h * D:(h + 1) * D] = jnp.dot(
            p.astype(BF16), v.astype(BF16),
            preferred_element_type=jnp.float32)                # (N, D)

    # single (N, C) x (C, C) projection (K = C -> full MXU contraction depth)
    proj = jnp.dot(ctx_ref[...].astype(BF16), wproj_ref[...],
                   preferred_element_type=jnp.float32)          # (N, C)
    o_ref[...] = (x + proj + bp_ref[...]).astype(o_ref.dtype)


# ---------------- kernel B: LN2 + MLP + residual ----------------

def ln_mlp_kernel(y_ref, g_ref, b_ref, w1_ref, b1_ref, w2_ref, b2_ref, o_ref,
                  *, eps):
    y = y_ref[...].astype(jnp.float32)                          # (row, C)
    yn = _layernorm_f32(y, g_ref[...], b_ref[...], eps)
    h = jnp.dot(yn.astype(BF16), w1_ref[...],
                preferred_element_type=jnp.float32) + b1_ref[...]
    h = _gelu_tanh(h)
    out = jnp.dot(h.astype(BF16), w2_ref[...],
                  preferred_element_type=jnp.float32) + b2_ref[...]
    o_ref[...] = (y + out).astype(o_ref.dtype)


# ---------------- wrapper ----------------

def _pick_row_tile(total, target=512):
    """Largest row tile <= target that evenly tiles `total` (multiple of 8)."""
    if total <= target:
        return total
    best = 8
    for r in range(8, target + 1, 8):
        if total % r == 0:
            best = r
    return best


def block_forward(x, params, num_heads):
    B, N, C = x.shape
    H = num_heads
    D = C // H
    scale = D ** (-0.5)
    Hid = params["w_fc1"].shape[0]
    dt = x.dtype

    x2d = x.reshape(B * N, C)              # pure reshape, no data movement

    # ---- one-time weight prep (amortized over all row tiles / layers) ----
    # fold attention scale into the q-rows of W_qkv, pre-transpose to (in, out),
    # cast to bf16 for MXU-native matmuls and halved VMEM/HBM footprint.
    w_qkv_scaled = params["w_qkv"].at[:C, :].multiply(scale)
    wqkv_t = w_qkv_scaled.T.astype(BF16)               # (C, 3C)
    wproj_t = params["w_proj"].T.astype(BF16)          # (C, C)
    wfc1_t = params["w_fc1"].T.astype(BF16)            # (C, Hid)
    wfc2_t = params["w_fc2"].T.astype(BF16)            # (Hid, C)

    g1 = params["ln1_g"].reshape(1, C).astype(jnp.float32)
    b1 = params["ln1_b"].reshape(1, C).astype(jnp.float32)
    g2 = params["ln2_g"].reshape(1, C).astype(jnp.float32)
    b2 = params["ln2_b"].reshape(1, C).astype(jnp.float32)
    bp = params["b_proj"].reshape(1, C).astype(jnp.float32)
    bf1 = params["b_fc1"].reshape(1, Hid).astype(jnp.float32)
    bf2 = params["b_fc2"].reshape(1, C).astype(jnp.float32)

    # --- K_attn: LN1 + QKV + attention (all heads) + out proj + residual ---
    y2d = pl.pallas_call(
        partial(attn_block_kernel, num_heads=H, head_dim=D, eps=LN_EPS),
        out_shape=jax.ShapeDtypeStruct((B * N, C), dt),
        grid=(B,),
        in_specs=[
            pl.BlockSpec((N, C), lambda b: (b, 0)),        # x (LN input + residual)
            pl.BlockSpec((1, C), lambda b: (0, 0)),        # ln1 gamma
            pl.BlockSpec((1, C), lambda b: (0, 0)),        # ln1 beta
            pl.BlockSpec((C, 3 * C), lambda b: (0, 0)),    # W_qkv^T (bf16, scale folded)
            pl.BlockSpec((C, C), lambda b: (0, 0)),        # W_proj^T (bf16)
            pl.BlockSpec((1, C), lambda b: (0, 0)),        # proj bias
        ],
        out_specs=pl.BlockSpec((N, C), lambda b: (b, 0)),
        scratch_shapes=[pltpu.VMEM((N, C), jnp.float32)],  # per-head ctx accumulator
        compiler_params=pltpu.CompilerParams(
            dimension_semantics=("parallel",),
            vmem_limit_bytes=VMEM_LIMIT),
        cost_estimate=pl.CostEstimate(
            flops=2 * B * N * C * 3 * C + 4 * B * H * N * N * D + 2 * B * N * C * C,
            transcendentals=B * H * N * N,
            bytes_accessed=(4 * 2 * B * N * C            # x in + y out (f32)
                            + 2 * (3 * C * C + C * C)    # bf16 weights
                            + 4 * 4 * C)),
    )(x2d, g1, b1, wqkv_t, wproj_t, bp)

    # --- K_mlp: LN2 + fc1 + GELU + fc2 + residual over large row tiles ---
    row = _pick_row_tile(B * N)
    n_row_blocks = (B * N) // row

    out2d = pl.pallas_call(
        partial(ln_mlp_kernel, eps=LN_EPS),
        out_shape=jax.ShapeDtypeStruct((B * N, C), dt),
        grid=(n_row_blocks,),
        in_specs=[
            pl.BlockSpec((row, C), lambda i: (i, 0)),      # y (LN input + residual)
            pl.BlockSpec((1, C), lambda i: (0, 0)),        # ln2 gamma
            pl.BlockSpec((1, C), lambda i: (0, 0)),        # ln2 beta
            pl.BlockSpec((C, Hid), lambda i: (0, 0)),      # W_fc1^T (bf16)
            pl.BlockSpec((1, Hid), lambda i: (0, 0)),      # fc1 bias
            pl.BlockSpec((Hid, C), lambda i: (0, 0)),      # W_fc2^T (bf16)
            pl.BlockSpec((1, C), lambda i: (0, 0)),        # fc2 bias
        ],
        out_specs=pl.BlockSpec((row, C), lambda i: (i, 0)),
        compiler_params=pltpu.CompilerParams(
            dimension_semantics=("parallel",),
            vmem_limit_bytes=VMEM_LIMIT),
        cost_estimate=pl.CostEstimate(
            flops=4 * B * N * C * Hid,
            transcendentals=B * N * Hid,
            bytes_accessed=(4 * 2 * B * N * C + 2 * 2 * C * Hid + 4 * (Hid + 3 * C))),
    )(y2d, g2, b2, wfc1_t, bf1, wfc2_t, bf2)

    return out2d.reshape(B, N, C)


# ---------------- reference (pure JAX, f32) ----------------

def block_reference(x, p, num_heads, eps=LN_EPS):
    B, N, C = x.shape
    H = num_heads
    D = C // H
    scale = D ** (-0.5)

    def ln(z, g, b):
        mu = z.mean(-1, keepdims=True)
        var = ((z - mu) ** 2).mean(-1, keepdims=True)
        return (z - mu) / jnp.sqrt(var + eps) * g + b

    xn = ln(x, p["ln1_g"], p["ln1_b"])
    qkv = (xn @ p["w_qkv"].T).reshape(B, N, 3, H, D).transpose(2, 0, 3, 1, 4)
    q, k, v = qkv[0], qkv[1], qkv[2]
    attn = jnp.einsum("bhnd,bhmd->bhnm", q, k) * scale
    attn = jax.nn.softmax(attn, axis=-1)
    ctx = jnp.einsum("bhnm,bhmd->bhnd", attn, v)
    ctx = ctx.transpose(0, 2, 1, 3).reshape(B, N, C)
    y = x + ctx @ p["w_proj"].T + p["b_proj"]
    yn = ln(y, p["ln2_g"], p["ln2_b"])
    h = _gelu_tanh(yn @ p["w_fc1"].T + p["b_fc1"])
    return y + h @ p["w_fc2"].T + p["b_fc2"]


# ---------------- main ----------------

if __name__ == "__main__":
    B, N, C, H = 2, 16, 128, 4        # head_dim = 32, mlp hidden = 512
    Hid = 4 * C

    key = jax.random.PRNGKey(0)
    ks = jax.random.split(key, 12)
    x = jax.random.normal(ks[0], (B, N, C), dtype=jnp.float32)
    params = {
        "ln1_g": 1.0 + 0.1 * jax.random.normal(ks[1], (C,), jnp.float32),
        "ln1_b": 0.1 * jax.random.normal(ks[2], (C,), jnp.float32),
        # nn.Linear weight layout: (out_features, in_features)
        "w_qkv": 0.05 * jax.random.normal(ks[3], (3 * C, C), jnp.float32),
        "w_proj": 0.05 * jax.random.normal(ks[4], (C, C), jnp.float32),
        "b_proj": 0.05 * jax.random.normal(ks[5], (C,), jnp.float32),
        "ln2_g": 1.0 + 0.1 * jax.random.normal(ks[6], (C,), jnp.float32),
        "ln2_b": 0.1 * jax.random.normal(ks[7], (C,), jnp.float32),
        "w_fc1": 0.05 * jax.random.normal(ks[8], (Hid, C), jnp.float32),
        "b_fc1": 0.05 * jax.random.normal(ks[9], (Hid,), jnp.float32),
        "w_fc2": 0.05 * jax.random.normal(ks[10], (C, Hid), jnp.float32),
        "b_fc2": 0.05 * jax.random.normal(ks[11], (C,), jnp.float32),
    }

    out = block_forward(x, params, num_heads=H)
    out = jax.block_until_ready(out)

    ref = block_reference(x, params, num_heads=H)
    assert out.shape == (B, N, C)
    # tolerance absorbs bf16 matmul operands (f32 accumulation) vs f32 reference
    assert jnp.allclose(out, ref, atol=2e-2, rtol=2e-2), "mismatch vs reference"

    print("KERNEL_OK")
</pallas_src>

<mosaic_0001>
module attributes {stable_mosaic.version = 11 : i64} {
  func.func @attn_block_kernel(%arg0: i32, %arg1: memref<16x128xf32, #tpu.memory_space<vmem>>, %arg2: memref<1x128xf32, #tpu.memory_space<vmem>>, %arg3: memref<1x128xf32, #tpu.memory_space<vmem>>, %arg4: memref<128x384xbf16, #tpu.memory_space<vmem>>, %arg5: memref<128x128xbf16, #tpu.memory_space<vmem>>, %arg6: memref<1x128xf32, #tpu.memory_space<vmem>>, %arg7: memref<16x128xf32, #tpu.memory_space<vmem>>, %arg8: memref<16x128xf32, #tpu.memory_space<vmem>>) attributes {dimension_semantics = [#tpu.dimension_semantics<parallel>], iteration_bounds = array<i64: 2>, scalar_prefetch = 0 : i64, scratch_operands = 1 : i64, tpu.core_type = #tpu.core_type<tc>, window_params = [{transform_indices = @transform_0, window_bounds = array<i64: 16, 128>}, {pipeline_mode = #tpu.pipeline_mode<synchronous>, transform_indices = @transform_1, window_bounds = array<i64: 1, 128>}, {pipeline_mode = #tpu.pipeline_mode<synchronous>, transform_indices = @transform_2, window_bounds = array<i64: 1, 128>}, {pipeline_mode = #tpu.pipeline_mode<synchronous>, transform_indices = @transform_3, window_bounds = array<i64: 128, 384>}, {pipeline_mode = #tpu.pipeline_mode<synchronous>, transform_indices = @transform_4, window_bounds = array<i64: 128, 128>}, {pipeline_mode = #tpu.pipeline_mode<synchronous>, transform_indices = @transform_5, window_bounds = array<i64: 1, 128>}, {transform_indices = @transform_6, window_bounds = array<i64: 16, 128>}]} {
    %c0 = arith.constant 0 : index
    %c0_0 = arith.constant 0 : index
    %0 = vector.load %arg1[%c0, %c0_0] : memref<16x128xf32, #tpu.memory_space<vmem>>, vector<16x128xf32>
    %c0_1 = arith.constant 0 : index
    %c0_2 = arith.constant 0 : index
    %1 = vector.load %arg2[%c0_1, %c0_2] : memref<1x128xf32, #tpu.memory_space<vmem>>, vector<1x128xf32>
    %c0_3 = arith.constant 0 : index
    %c0_4 = arith.constant 0 : index
    %2 = vector.load %arg3[%c0_3, %c0_4] : memref<1x128xf32, #tpu.memory_space<vmem>>, vector<1x128xf32>
    %cst = arith.constant dense<0.000000e+00> : vector<16xf32>
    %3 = vector.multi_reduction <add>, %0, %cst [1] : vector<16x128xf32> to vector<16xf32>
    %4 = vector.shape_cast %3 : vector<16xf32> to vector<16x1xf32>
    %cst_5 = arith.constant 1.280000e+02 : f32
    %5 = vector.broadcast %cst_5 : f32 to vector<16x1xf32>
    %6 = arith.divf %4, %5 : vector<16x1xf32>
    %7 = vector.broadcast %6 : vector<16x1xf32> to vector<16x128xf32>
    %8 = arith.subf %0, %7 : vector<16x128xf32>
    %9 = arith.mulf %8, %8 : vector<16x128xf32>
    %cst_6 = arith.constant dense<0.000000e+00> : vector<16xf32>
    %10 = vector.multi_reduction <add>, %9, %cst_6 [1] : vector<16x128xf32> to vector<16xf32>
    %11 = vector.shape_cast %10 : vector<16xf32> to vector<16x1xf32>
    %cst_7 = arith.constant 1.280000e+02 : f32
    %12 = vector.broadcast %cst_7 : f32 to vector<16x1xf32>
    %13 = arith.divf %11, %12 : vector<16x1xf32>
    %14 = vector.broadcast %6 : vector<16x1xf32> to vector<16x128xf32>
    %15 = arith.subf %0, %14 : vector<16x128xf32>
    %cst_8 = arith.constant 9.99999974E-6 : f32
    %16 = vector.broadcast %cst_8 : f32 to vector<16x1xf32>
    %17 = arith.addf %13, %16 : vector<16x1xf32>
    %18 = math.rsqrt %17 : vector<16x1xf32>
    %19 = vector.broadcast %18 : vector<16x1xf32> to vector<16x128xf32>
    %20 = arith.mulf %15, %19 : vector<16x128xf32>
    %21 = vector.broadcast %1 : vector<1x128xf32> to vector<16x128xf32>
    %22 = arith.mulf %20, %21 : vector<16x128xf32>
    %23 = vector.broadcast %2 : vector<1x128xf32> to vector<16x128xf32>
    %24 = arith.addf %22, %23 : vector<16x128xf32>
    %25 = arith.truncf %24 : vector<16x128xf32> to vector<16x128xbf16>
    %c0_9 = arith.constant 0 : index
    %c0_10 = arith.constant 0 : index
    %26 = vector.load %arg4[%c0_9, %c0_10] : memref<128x384xbf16, #tpu.memory_space<vmem>>, vector<128x384xbf16>
    %cst_11 = arith.constant dense<0.000000e+00> : vector<16x384xf32>
    %27 = tpu.matmul %25, %26, %cst_11 {dimension_numbers = #tpu.dot_dimension_numbers<[1], [0], [0], [1], [0, 0, 1, 1], [], []>} : vector<16x128xbf16>, vector<128x384xbf16>, vector<16x384xf32> -> vector<16x384xf32>
    %28 = vector.extract_strided_slice %27 {offsets = [0, 0], sizes = [16, 32], strides = [1, 1]} : vector<16x384xf32> to vector<16x32xf32>
    %29 = vector.extract_strided_slice %27 {offsets = [0, 128], sizes = [16, 32], strides = [1, 1]} : vector<16x384xf32> to vector<16x32xf32>
    %30 = vector.extract_strided_slice %27 {offsets = [0, 256], sizes = [16, 32], strides = [1, 1]} : vector<16x384xf32> to vector<16x32xf32>
    %31 = arith.truncf %28 : vector<16x32xf32> to vector<16x32xbf16>
    %32 = arith.truncf %29 : vector<16x32xf32> to vector<16x32xbf16>
    %cst_12 = arith.constant dense<0.000000e+00> : vector<16x16xf32>
    %33 = tpu.matmul %31, %32, %cst_12 {dimension_numbers = #tpu.dot_dimension_numbers<[1], [1], [0], [0], [0, 0, 1, 0], [], []>} : vector<16x32xbf16>, vector<16x32xbf16>, vector<16x16xf32> -> vector<16x16xf32>
    %cst_13 = arith.constant dense<0xFF800000> : vector<16xf32>
    %34 = vector.multi_reduction <maximumf>, %33, %cst_13 [1] : vector<16x16xf32> to vector<16xf32>
    %35 = vector.shape_cast %34 : vector<16xf32> to vector<16x1xf32>
    %36 = vector.broadcast %35 : vector<16x1xf32> to vector<16x16xf32>
    %37 = arith.subf %33, %36 : vector<16x16xf32>
    %38 = math.exp %37 : vector<16x16xf32>
    %cst_14 = arith.constant dense<0.000000e+00> : vector<16xf32>
    %39 = vector.multi_reduction <add>, %38, %cst_14 [1] : vector<16x16xf32> to vector<16xf32>
    %40 = vector.shape_cast %39 : vector<16xf32> to vector<16x1xf32>
    %41 = vector.broadcast %40 : vector<16x1xf32> to vector<16x16xf32>
    %42 = arith.divf %38, %41 : vector<16x16xf32>
    %43 = arith.truncf %42 : vector<16x16xf32> to vector<16x16xbf16>
    %44 = arith.truncf %30 : vector<16x32xf32> to vector<16x32xbf16>
    %cst_15 = arith.constant dense<0.000000e+00> : vector<16x32xf32>
    %45 = tpu.matmul %43, %44, %cst_15 {dimension_numbers = #tpu.dot_dimension_numbers<[1], [0], [0], [1], [0, 0, 1, 1], [], []>} : vector<16x16xbf16>, vector<16x32xbf16>, vector<16x32xf32> -> vector<16x32xf32>
    %c0_16 = arith.constant 0 : index
    %c0_17 = arith.constant 0 : index
    %46 = vector.load %arg8[%c0_16, %c0_17] : memref<16x128xf32, #tpu.memory_space<vmem>>, vector<16x32xf32>
    tpu.vector_store %arg8[%c0_16, %c0_17], %45 {strides = array<i32>} : memref<16x128xf32, #tpu.memory_space<vmem>>, vector<16x32xf32>,
    %47 = vector.extract_strided_slice %27 {offsets = [0, 32], sizes = [16, 32], strides = [1, 1]} : vector<16x384xf32> to vector<16x32xf32>
    %48 = vector.extract_strided_slice %27 {offsets = [0, 160], sizes = [16, 32], strides = [1, 1]} : vector<16x384xf32> to vector<16x32xf32>
    %49 = vector.extract_strided_slice %27 {offsets = [0, 288], sizes = [16, 32], strides = [1, 1]} : vector<16x384xf32> to vector<16x32xf32>
    %50 = arith.truncf %47 : vector<16x32xf32> to vector<16x32xbf16>
    %51 = arith.truncf %48 : vector<16x32xf32> to vector<16x32xbf16>
    %cst_18 = arith.constant dense<0.000000e+00> : vector<16x16xf32>
    %52 = tpu.matmul %50, %51, %cst_18 {dimension_numbers = #tpu.dot_dimension_numbers<[1], [1], [0], [0], [0, 0, 1, 0], [], []>} : vector<16x32xbf16>, vector<16x32xbf16>, vector<16x16xf32> -> vector<16x16xf32>
    %cst_19 = arith.constant dense<0xFF800000> : vector<16xf32>
    %53 = vector.multi_reduction <maximumf>, %52, %cst_19 [1] : vector<16x16xf32> to vector<16xf32>
    %54 = vector.shape_cast %53 : vector<16xf32> to vector<16x1xf32>
    %55 = vector.broadcast %54 : vector<16x1xf32> to vector<16x16xf32>
    %56 = arith.subf %52, %55 : vector<16x16xf32>
    %57 = math.exp %56 : vector<16x16xf32>
    %cst_20 = arith.constant dense<0.000000e+00> : vector<16xf32>
    %58 = vector.multi_reduction <add>, %57, %cst_20 [1] : vector<16x16xf32> to vector<16xf32>
    %59 = vector.shape_cast %58 : vector<16xf32> to vector<16x1xf32>
    %60 = vector.broadcast %59 : vector<16x1xf32> to vector<16x16xf32>
    %61 = arith.divf %57, %60 : vector<16x16xf32>
    %62 = arith.truncf %61 : vector<16x16xf32> to vector<16x16xbf16>
    %63 = arith.truncf %49 : vector<16x32xf32> to vector<16x32xbf16>
    %cst_21 = arith.constant dense<0.000000e+00> : vector<16x32xf32>
    %64 = tpu.matmul %62, %63, %cst_21 {dimension_numbers = #tpu.dot_dimension_numbers<[1], [0], [0], [1], [0, 0, 1, 1], [], []>} : vector<16x16xbf16>, vector<16x32xbf16>, vector<16x32xf32> -> vector<16x32xf32>
    %c0_22 = arith.constant 0 : index
    %c32 = arith.constant 32 : index
    %65 = vector.load %arg8[%c0_22, %c32] : memref<16x128xf32, #tpu.memory_space<vmem>>, vector<16x32xf32>
    tpu.vector_store %arg8[%c0_22, %c32], %64 {strides = array<i32>} : memref<16x128xf32, #tpu.memory_space<vmem>>, vector<16x32xf32>,
    %66 = vector.extract_strided_slice %27 {offsets = [0, 64], sizes = [16, 32], strides = [1, 1]} : vector<16x384xf32> to vector<16x32xf32>
    %67 = vector.extract_strided_slice %27 {offsets = [0, 192], sizes = [16, 32], strides = [1, 1]} : vector<16x384xf32> to vector<16x32xf32>
    %68 = vector.extract_strided_slice %27 {offsets = [0, 320], sizes = [16, 32], strides = [1, 1]} : vector<16x384xf32> to vector<16x32xf32>
    %69 = arith.truncf %66 : vector<16x32xf32> to vector<16x32xbf16>
    %70 = arith.truncf %67 : vector<16x32xf32> to vector<16x32xbf16>
    %cst_23 = arith.constant dense<0.000000e+00> : vector<16x16xf32>
    %71 = tpu.matmul %69, %70, %cst_23 {dimension_numbers = #tpu.dot_dimension_numbers<[1], [1], [0], [0], [0, 0, 1, 0], [], []>} : vector<16x32xbf16>, vector<16x32xbf16>, vector<16x16xf32> -> vector<16x16xf32>
    %cst_24 = arith.constant dense<0xFF800000> : vector<16xf32>
    %72 = vector.multi_reduction <maximumf>, %71, %cst_24 [1] : vector<16x16xf32> to vector<16xf32>
    %73 = vector.shape_cast %72 : vector<16xf32> to vector<16x1xf32>
    %74 = vector.broadcast %73 : vector<16x1xf32> to vector<16x16xf32>
    %75 = arith.subf %71, %74 : vector<16x16xf32>
    %76 = math.exp %75 : vector<16x16xf32>
    %cst_25 = arith.constant dense<0.000000e+00> : vector<16xf32>
    %77 = vector.multi_reduction <add>, %76, %cst_25 [1] : vector<16x16xf32> to vector<16xf32>
    %78 = vector.shape_cast %77 : vector<16xf32> to vector<16x1xf32>
    %79 = vector.broadcast %78 : vector<16x1xf32> to vector<16x16xf32>
    %80 = arith.divf %76, %79 : vector<16x16xf32>
    %81 = arith.truncf %80 : vector<16x16xf32> to vector<16x16xbf16>
    %82 = arith.truncf %68 : vector<16x32xf32> to vector<16x32xbf16>
    %cst_26 = arith.constant dense<0.000000e+00> : vector<16x32xf32>
    %83 = tpu.matmul %81, %82, %cst_26 {dimension_numbers = #tpu.dot_dimension_numbers<[1], [0], [0], [1], [0, 0, 1, 1], [], []>} : vector<16x16xbf16>, vector<16x32xbf16>, vector<16x32xf32> -> vector<16x32xf32>
    %c0_27 = arith.constant 0 : index
    %c64 = arith.constant 64 : index
    %84 = vector.load %arg8[%c0_27, %c64] : memref<16x128xf32, #tpu.memory_space<vmem>>, vector<16x32xf32>
    tpu.vector_store %arg8[%c0_27, %c64], %83 {strides = array<i32>} : memref<16x128xf32, #tpu.memory_space<vmem>>, vector<16x32xf32>,
    %85 = vector.extract_strided_slice %27 {offsets = [0, 96], sizes = [16, 32], strides = [1, 1]} : vector<16x384xf32> to vector<16x32xf32>
    %86 = vector.extract_strided_slice %27 {offsets = [0, 224], sizes = [16, 32], strides = [1, 1]} : vector<16x384xf32> to vector<16x32xf32>
    %87 = vector.extract_strided_slice %27 {offsets = [0, 352], sizes = [16, 32], strides = [1, 1]} : vector<16x384xf32> to vector<16x32xf32>
    %88 = arith.truncf %85 : vector<16x32xf32> to vector<16x32xbf16>
    %89 = arith.truncf %86 : vector<16x32xf32> to vector<16x32xbf16>
    %cst_28 = arith.constant dense<0.000000e+00> : vector<16x16xf32>
    %90 = tpu.matmul %88, %89, %cst_28 {dimension_numbers = #tpu.dot_dimension_numbers<[1], [1], [0], [0], [0, 0, 1, 0], [], []>} : vector<16x32xbf16>, vector<16x32xbf16>, vector<16x16xf32> -> vector<16x16xf32>
    %cst_29 = arith.constant dense<0xFF800000> : vector<16xf32>
    %91 = vector.multi_reduction <maximumf>, %90, %cst_29 [1] : vector<16x16xf32> to vector<16xf32>
    %92 = vector.shape_cast %91 : vector<16xf32> to vector<16x1xf32>
    %93 = vector.broadcast %92 : vector<16x1xf32> to vector<16x16xf32>
    %94 = arith.subf %90, %93 : vector<16x16xf32>
    %95 = math.exp %94 : vector<16x16xf32>
    %cst_30 = arith.constant dense<0.000000e+00> : vector<16xf32>
    %96 = vector.multi_reduction <add>, %95, %cst_30 [1] : vector<16x16xf32> to vector<16xf32>
    %97 = vector.shape_cast %96 : vector<16xf32> to vector<16x1xf32>
    %98 = vector.broadcast %97 : vector<16x1xf32> to vector<16x16xf32>
    %99 = arith.divf %95, %98 : vector<16x16xf32>
    %100 = arith.truncf %99 : vector<16x16xf32> to vector<16x16xbf16>
    %101 = arith.truncf %87 : vector<16x32xf32> to vector<16x32xbf16>
    %cst_31 = arith.constant dense<0.000000e+00> : vector<16x32xf32>
    %102 = tpu.matmul %100, %101, %cst_31 {dimension_numbers = #tpu.dot_dimension_numbers<[1], [0], [0], [1], [0, 0, 1, 1], [], []>} : vector<16x16xbf16>, vector<16x32xbf16>, vector<16x32xf32> -> vector<16x32xf32>
    %c0_32 = arith.constant 0 : index
    %c96 = arith.constant 96 : index
    %103 = vector.load %arg8[%c0_32, %c96] : memref<16x128xf32, #tpu.memory_space<vmem>>, vector<16x32xf32>
    tpu.vector_store %arg8[%c0_32, %c96], %102 {strides = array<i32>} : memref<16x128xf32, #tpu.memory_space<vmem>>, vector<16x32xf32>,
    %c0_33 = arith.constant 0 : index
    %c0_34 = arith.constant 0 : index
    %104 = vector.load %arg8[%c0_33, %c0_34] : memref<16x128xf32, #tpu.memory_space<vmem>>, vector<16x128xf32>
    %105 = arith.truncf %104 : vector<16x128xf32> to vector<16x128xbf16>
    %c0_35 = arith.constant 0 : index
    %c0_36 = arith.constant 0 : index
    %106 = vector.load %arg5[%c0_35, %c0_36] : memref<128x128xbf16, #tpu.memory_space<vmem>>, vector<128x128xbf16>
    %cst_37 = arith.constant dense<0.000000e+00> : vector<16x128xf32>
    %107 = tpu.matmul %105, %106, %cst_37 {dimension_numbers = #tpu.dot_dimension_numbers<[1], [0], [0], [1], [0, 0, 1, 1], [], []>} : vector<16x128xbf16>, vector<128x128xbf16>, vector<16x128xf32> -> vector<16x128xf32>
    %108 = arith.addf %0, %107 : vector<16x128xf32>
    %c0_38 = arith.constant 0 : index
    %c0_39 = arith.constant 0 : index
    %109 = vector.load %arg6[%c0_38, %c0_39] : memref<1x128xf32, #tpu.memory_space<vmem>>, vector<1x128xf32>
    %110 = vector.broadcast %109 : vector<1x128xf32> to vector<16x128xf32>
    %111 = arith.addf %108, %110 : vector<16x128xf32>
    %c0_40 = arith.constant 0 : index
    %c0_41 = arith.constant 0 : index
    %112 = vector.load %arg7[%c0_40, %c0_41] : memref<16x128xf32, #tpu.memory_space<vmem>>, vector<16x128xf32>
    tpu.vector_store %arg7[%c0_40, %c0_41], %111 {strides = array<i32>} : memref<16x128xf32, #tpu.memory_space<vmem>>, vector<16x128xf32>,
    return
  }
  func.func @transform_0(%arg0: i32) -> (i32, i32) {
    %c0_i32 = arith.constant 0 : i32
    %c0_i32_0 = arith.constant 0 : i32
    return %arg0, %c0_i32 : i32, i32
  }
  func.func @transform_1(%arg0: i32) -> (i32, i32) {
    %c0_i32 = arith.constant 0 : i32
    %c0_i32_0 = arith.constant 0 : i32
    %c0_i32_1 = arith.constant 0 : i32
    return %c0_i32, %c0_i32_0 : i32, i32
  }
  func.func @transform_2(%arg0: i32) -> (i32, i32) {
    %c0_i32 = arith.constant 0 : i32
    %c0_i32_0 = arith.constant 0 : i32
    %c0_i32_1 = arith.constant 0 : i32
    return %c0_i32, %c0_i32_0 : i32, i32
  }
  func.func @transform_3(%arg0: i32) -> (i32, i32) {
    %c0_i32 = arith.constant 0 : i32
    %c0_i32_0 = arith.constant 0 : i32
    %c0_i32_1 = arith.constant 0 : i32
    return %c0_i32, %c0_i32_0 : i32, i32
  }
  func.func @transform_4(%arg0: i32) -> (i32, i32) {
    %c0_i32 = arith.constant 0 : i32
    %c0_i32_0 = arith.constant 0 : i32
    %c0_i32_1 = arith.constant 0 : i32
    return %c0_i32, %c0_i32_0 : i32, i32
  }
  func.func @transform_5(%arg0: i32) -> (i32, i32) {
    %c0_i32 = arith.constant 0 : i32
    %c0_i32_0 = arith.constant 0 : i32
    %c0_i32_1 = arith.constant 0 : i32
    return %c0_i32, %c0_i32_0 : i32, i32
  }
  func.func @transform_6(%arg0: i32) -> (i32, i32) {
    %c0_i32 = arith.constant 0 : i32
    %c0_i32_0 = arith.constant 0 : i32
    return %arg0, %c0_i32 : i32, i32
  }
}

</mosaic_0001>

<bundles_post_ra>
// kernel: tpu_custom_call.1
= control target key start
LH: loop header
LB: loop body
LE: loop exit
PB: predicated region body
PF: predicated region fallthrough
CT: control target
= control target key end

     0   :  { %11 = vsyncpa [#allocation4], 0  ;;  %s2252_s0 = inlined_call_operand.hbm [shape: f32[32,128], index: 0, kind: input, shape index: {}]   ;;  %s2253_s1 = inlined_call_operand.vmem [shape: f32[1,128], index: 1, kind: input, shape index: {}]   ;;  %s2254_s2 = inlined_call_operand.vmem [shape: f32[1,128], index: 2, kind: input, shape index: {}]   ;;  %s2255_s3 = inlined_call_operand.hbm [shape: bf16[128,384], index: 3, kind: input, shape index: {}]   ;;  %s2256_s4 = inlined_call_operand.hbm [shape: bf16[128,128], index: 4, kind: input, shape index: {}]   ;;  %s2257_s5 = inlined_call_operand.vmem [shape: f32[1,128], index: 5, kind: input, shape index: {}]   ;;  %s2258_s6 = inlined_call_operand.hbm [shape: f32[32,128], index: 6, kind: output, shape index: {}]  }
   0x1   :  { %13 = vsyncpa [#allocation4 + $0x1], 0 }
   0x2   :  { %14 = vsyncpa [#allocation7], 0 }
   0x3   :  { %15 = vsyncpa [#allocation5], 0 }
   0x4   :  { %17 = vsyncpa [#allocation5 + $0x1], 0  ;;  %s1890_s21 = smov 0   ;;  %s1892_s22 = smov 0  }
   0x5   :  { %s1894_s23 = smov 0   ;;  %s1896_s24 = smov 0  }
   0x6 LB: > { %s1911_s25 = sadd.s32 4294967295, %s1835_s24   ;;  %s1337_s26 = sadd.s32 4294967294, %s1835_s24   ;;  %s1835_s24 = sphi %s1896_s24, %s2278_s24   ;;  %s1831_s23 = sphi %s1894_s23, %s2277_s23   ;;  %s1827_s22 = sphi %s1892_s22, %s2276_s22   ;;  %s1823_s21 = sphi %s1890_s21, %s2275_s21  }
   0x7   : > { %p43_p0 = scmp.ne.s32.totalorder %s1827_s22, %s1823_s21  ;;  %p2259_p1 = scmp.eq.s32.totalorder %s1911_s25, 0 }
   0x8   : > { %p178_p3 = scmp.eq.s32.totalorder %s1337_s26, 1  ;;  %p1338_p5 = scmp.ge.s32.totalorder %s1835_s24, 1 }
   0x9   : > { %p1920_p4 = por %p2259_p1, %p43_p0  ;;  %p185_p7 = scmp.lt.s32.totalorder %s1835_s24, 3 }
   0xa   : > { %p1925_p6 = por %p178_p3, %p43_p0  ;;  %s1837_s30 = smov [#allocation6]  }
   0xb   : > { %s2262_s27 = scalar_select %p1920_p4, 1, 0 }
   0xc   : > { %s2263_s28 = scalar_select %p1925_p6, 1, 0 }
   0xd   : > { %p1930_p8 = pnand %p1338_p5, %p185_p7  ;;  %s203_s7 = sshll.u32 %s1837_s30, 4  ;;  %s1934_s7 = int_to_ptr.vmem [resolvable:$true] %s203_s7 }
   0xe   : > { %s1838_s9 = smov [#allocation8]   ;;  %s1679_s13 = scalar_lea.hbm %s2255_s3, 3072 }
   0xf   : > { %p1534_p9 = pneg %p1930_p8  ;;  %s216_s10 = sshll.u32 %s1838_s9, 4  ;;  %s1945_s10 = int_to_ptr.vmem [resolvable:$true] %s216_s10 }
  0x10   : > { %p1680_p12 = scmp.ne.s32.totalorder %s2255_s3, %s1679_s13  ;;  %p1686_p5 = scmp.lt.u32.totalorder %s1679_s13, %s2255_s3 }
  0x11   : > { %p1941_p11 = pnand %p1534_p9, %p2259_p1 }
  0x13   : > { %p1681_p13 = pneg %p1941_p11 }
  0x15   : > { %p1682_p0 = pnand %p1681_p13, %p1680_p12 }
  0x17   : > { %p1683_p3 = pneg %p1682_p0 }
  0x19   : > { %p1688_p7 = pnand %p1686_p5, %p1683_p3 }
  0x1b   : > { %1691 = shalt.err (!%p1688_p7)
}
  0x1c   : > { %s1692_s18 = scalar_lea.vmem %s1934_s7, 3072  ;;  %p1700_p2 = scmp.lt.s32.totalorder %s1934_s7, %s1934_s7 }
  0x1d   : > { %p1693_p9 = scmp.ne.s32.totalorder %s1934_s7, %s1692_s18  ;;  %p1701_p12 = scmp.lt.s32.totalorder %s1692_s18, %s1692_s18 }
  0x1f   : > { %p1695_p10 = pnand %p1693_p9, %p1681_p13  ;;  %p1702_p0 = por %p1701_p12, %p1700_p2 }
  0x21   : > { %p1696_p1 = pneg %p1695_p10 }
  0x23   : > { %p1703_p6 = pnand %p1702_p0, %p1696_p1 }
  0x25   : > { %1706 = shalt.err (!%p1703_p6)
}
  0x26   : > { %s1839_s19 = smov 192   ;;  %s1840_s20 = smov 12  }
  0x27   : > { %1537 = dma.hbm_to_vmem [thread:$0]  (!%p1941_p11), %s2255_s3, 3072, %s1934_s7, [#allocation7], %s1839_s19, %s1839_s19, %s1840_s20  }
  0x28   : > { %s1707_s12 = scalar_lea.hbm %s2256_s4, 1024 }
  0x29   : > { %p1708_p2 = scmp.ne.s32.totalorder %s2256_s4, %s1707_s12  ;;  %p1714_p10 = scmp.lt.u32.totalorder %s1707_s12, %s2256_s4 }
  0x2b   : > { %p1710_p1 = pnand %p1708_p2, %p1681_p13 }
  0x2d   : > { %p1711_p6 = pneg %p1710_p1 }
  0x2f   : > { %p1716_p3 = pnand %p1714_p10, %p1711_p6 }
  0x31   : > { %1719 = shalt.err (!%p1716_p3)
}
  0x32   : > { %s1720_s7 = scalar_lea.vmem %s1945_s10, 1024  ;;  %p1728_p12 = scmp.lt.s32.totalorder %s1945_s10, %s1945_s10 }
  0x33   : > { %p1721_p5 = scmp.ne.s32.totalorder %s1945_s10, %s1720_s7  ;;  %p1729_p0 = scmp.lt.s32.totalorder %s1720_s7, %s1720_s7 }
  0x35   : > { %p1723_p7 = pnand %p1721_p5, %p1681_p13  ;;  %p1730_p2 = por %p1729_p0, %p1728_p12 }
  0x37   : > { %p1724_p9 = pneg %p1723_p7 }
  0x39   : > { %p1731_p1 = pnand %p1730_p2, %p1724_p9 }
  0x3b   : > { %1734 = shalt.err (!%p1731_p1)
}
  0x3c   : > { %s1841_s17 = smov 64   ;;  %s1842_s18 = smov 4  }
  0x3d   : > { %1540 = dma.hbm_to_vmem [thread:$0]  (!%p1941_p11), %s2256_s4, 1024, %s1945_s10, [#allocation7], %s1841_s17, %s1841_s17, %s1842_s18  }
  0x3e   : > { %s2000_s26 = sadd.s32 1, %s1835_s24   ;;  %s30_s9 = sadd.s32 1, %s1831_s23 }
  0x3f   : > { %s27_s30 = ssub.s32 %s1835_s24, %s2000_s26  ;;  %p37_p6 = scmp.ne.s32.totalorder %s1831_s23, %s1827_s22 }
  0x40   : > { %p28_p13 = scmp.eq.s32.totalorder %s27_s30, 0  ;;  %p38_p10 = scmp.eq.s32.totalorder %s1835_s24, 0 }
  0x41   : > { %p2266_p5 = scmp.eq.s32.totalorder %s1911_s25, 1  ;;  %p1551_p9 = scmp.lt.s32.totalorder %s1835_s24, 2 }
  0x42   : > { %s2009_s11 = scalar_select %p28_p13, %s1831_s23, %s30_s9  }
  0x43   : > { %p39_p3 = por %p38_p10, %p37_p6  ;;  %p2013_p7 = por %p2266_p5, %p37_p6 }
  0x44   : > { %s233_s8 = sand.u32 1, %s1831_s23   ;;  %s1398_s10 = sshll.u32 %s1835_s24, 8 }
  0x45   : > { %s2267_s12 = scalar_select %p2013_p7, 1, 0 }
  0x46   : > { %s1342_s13 = sshll.u32 %s233_s8, 4  ;;  %s2023_s16 = scalar_lea.hbm %s2252_s0, %s1398_s10 }
  0x47   : > { %s237_s7 = scalar_lea.vmem [#allocation3], %s1342_s13  ;;  %p2027_p11 = pnand %p1551_p9, %p39_p3 }
  0x48   : > { %s244_s17 = sshll.u32 %s237_s7, 4  ;;  %s2031_s19 = scalar_lea.sflag [#allocation4], %s233_s8  ;;  %s2025_s17 = int_to_ptr.vmem [resolvable:$true] %s244_s17 }
  0x49   : > { %s1735_s20 = scalar_lea.hbm %s2023_s16, 256  ;;  %p1737_p0 = pneg %p2027_p11 }
  0x4a   : > { %p1736_p12 = scmp.ne.s32.totalorder %s2023_s16, %s1735_s20  ;;  %s1740_s13 = scalar_lea.hbm %s2252_s0, 512 }
  0x4b   : > { %p1741_p13 = scmp.lt.u32.totalorder %s2023_s16, %s2252_s0  ;;  %p1742_p6 = scmp.lt.u32.totalorder %s1740_s13, %s1735_s20 }
  0x4c   : > { %p1738_p2 = pnand %p1737_p0, %p1736_p12  ;;  %p1744_p3 = scmp.lt.u32.totalorder %s1735_s20, %s2023_s16 }
  0x4d   : > { %p1743_p10 = por %p1742_p6, %p1741_p13 }
  0x4e   : > { %p1739_p1 = pneg %p1738_p2 }
  0x4f   : > { %p1745_p5 = por %p1744_p3, %p1743_p10 }
  0x51   : > { %p1746_p9 = pnand %p1745_p5, %p1739_p1 }
  0x53   : > { %1749 = shalt.err (!%p1746_p9)
}
  0x54   : > { %s1750_s8 = scalar_lea.vmem %s2025_s17, 256  ;;  %s1843_s15 = smov [#allocation3]  }
  0x55   : > { %p1751_p12 = scmp.ne.s32.totalorder %s2025_s17, %s1750_s8  ;;  %s1755_s7 = sshll.u32 %s1843_s15, 4  ;;  %s1756_s7 = int_to_ptr.vmem [resolvable:$false] %s1755_s7 }
  0x56   : > { %s1757_s30 = scalar_lea.vmem %s1756_s7, 512  ;;  %p1758_p4 = scmp.lt.s32.totalorder %s2025_s17, %s1756_s7 }
  0x57   : > { %p1753_p2 = pnand %p1751_p12, %p1737_p0  ;;  %p1759_p13 = scmp.lt.s32.totalorder %s1757_s30, %s1750_s8 }
  0x59   : > { %p1754_p7 = pneg %p1753_p2  ;;  %p1760_p6 = por %p1759_p13, %p1758_p4 }
  0x5b   : > { %p1761_p10 = pnand %p1760_p6, %p1754_p7 }
  0x5d   : > { %1764 = shalt.err (!%p1761_p10)
}
  0x5e   : > { %s1844_s20 = smov 128   ;;  %s1845_s9 = smov 8  }
  0x5f   : > { %1544 = dma.hbm_to_vmem [thread:$0]  (!%p2027_p11), %s2023_s16, 256, %s2025_s17, %s2031_s19, %s1844_s20, %s1844_s20, %s1845_s9  }
  0x60   : > { %256 = sbr.rel (%p1930_p8) target bundleno = 2321 (0x911), region = 44  ;;  %s2062_s13 = sand.u32 (!%p1930_p8), 1, %s1827_s22  }
  0x61   : > { %s1346_s10 = sshll.u32 (!%p1930_p8), %s2062_s13, 4  ;;  %s259_s14 = scalar_lea.sflag (!%p1930_p8), [#allocation4], %s2062_s13 }
  0x62   : > { %s262_s8 = scalar_lea.vmem (!%p1930_p8), [#allocation3], %s1346_s10  ;;  %p2269_p4 = scmp.ne.s32.totalorder (!%p1930_p8), %s2262_s27, 0 }
  0x67   : > { %1810 = dma.done.wait (%p2269_p4), %s259_s14, 256  }
  0x68   : > { %1812 = vsyncadd (%p2269_p4), %s259_s14, 4294967040  ;;  %p2270_p7 = scmp.eq.s32.totalorder %s1911_s25, 0 }
  0x6a   : > { %1814 = dma.done.wait (%p2270_p7), [#allocation7], 4096   ;;  %p2271_p8 = pmov %p2270_p7 }
  0x6b   : > { %v2076_v0 = vld [vmem:[%s262_s8] sm:$0xff]  ;;  %v2078_v1 = vld [vmem:[%s262_s8 + $0x8] sm:$0xff]  ;;  %v1846_v4 = vmov 0.0   ;;  %v1847_v30 = vmov 0   ;;  %vm1848_vm0 = vmmov 0   ;;  %vm592_vm1 = vcmask 261120  }
  0x6c   : > { %1816 = vsyncadd (%p2271_p8), [#allocation7], 4294963200  ;;  %306 = vadd.xlane.f32.xlu0 %v2076_v0  ;;  %v1603_v2 = vld [vmem:[#allocation6 + $0x4] ss:$12 sps:$4 sm:$0xff]   ;;  %v1605_v3 = vld [vmem:[#allocation6] ss:$12 sps:$4 sm:$0xff]   ;;  %1434 = vmatprep.subr.bf16.mxu1 %v1846_v4 }
  0x6d   : > { %v1606_v5 = vld [vmem:[#allocation6 + $0x8] ss:$12 sps:$4 sm:$0xff]   ;;  %506 = vmatprep.subr.bf16.mxu0 %v1603_v2  ;;  %v1609_v15 = vld [vmem:[#allocation6 + $0x18] ss:$12 sps:$4 sm:$0xff]   ;;  %v1610_v16 = vld [vmem:[#allocation6 + $0x20] ss:$12 sps:$4 sm:$0xff]   ;;  %538 = vmatprep.mubr.bf16.mxu0 %v1847_v30 }
  0x6e   : > { %v1607_v6 = vld [vmem:[#allocation6 + $0x1c] ss:$12 sps:$4 sm:$0xff]   ;;  %507 = vmatpush1.bf16.msra.mxu0 %v1605_v3  ;;  %1435 = vmatpush3.bf16.msra.mxu1 %v1606_v5  ;;  %v1611_v17 = vld [vmem:[#allocation6 + $0x34] ss:$12 sps:$4 sm:$0xff]   ;;  %v1614_v19 = vld [vmem:[#allocation6 + $0x38] ss:$12 sps:$4 sm:$0xff]  }
  0x6f   : > { %508 = vmatprep.subr.bf16.mxu0 %v1607_v6  ;;  %1436 = vmatprep.subr.bf16.mxu1 %v1846_v4  ;;  %v1613_v18 = vld [vmem:[#allocation6 + $0x30] ss:$12 sps:$4 sm:$0xff]   ;;  %v1615_v20 = vld [vmem:[#allocation6 + $0x4c] ss:$12 sps:$4 sm:$0xff]   ;;  %v1617_v21 = vld [vmem:[#allocation6 + $0x48] ss:$12 sps:$4 sm:$0xff]  }
  0x70   : > { %308 = vadd.xlane.f32.xlu0 %v2078_v1  ;;  %v1618_v22 = vld [vmem:[#allocation6 + $0x50] ss:$12 sps:$4 sm:$0xff]   ;;  %v1621_v24 = vld [vmem:[#allocation6 + $0x60] ss:$12 sps:$4 sm:$0xff]   ;;  %v1622_v25 = vld [vmem:[#allocation6 + $0x68] ss:$12 sps:$4 sm:$0xff]   ;;  %1450 = vmatprep.mubr.msk.bf16.mxu1 %vm1848_vm0, %v1846_v4 }
  0x71   : > { %v1619_v23 = vld [vmem:[#allocation6 + $0x64] ss:$12 sps:$4 sm:$0xff]   ;;  %v1623_v26 = vld [vmem:[#allocation6 + $0x7c] ss:$12 sps:$4 sm:$0xff]   ;;  %v1626_v28 = vld [vmem:[#allocation6 + $0x80] ss:$12 sps:$4 sm:$0xff]  }
  0x72   : > { %509 = vmatpush1.bf16.msra.mxu0 %v1609_v15  ;;  %1437 = vmatpush3.bf16.msra.mxu1 %v1610_v16  ;;  %v1625_v27 = vld [vmem:[#allocation6 + $0x78] ss:$12 sps:$4 sm:$0xff]   ;;  %v1627_v29 = vld [vmem:[#allocation6 + $0x94] ss:$12 sps:$4 sm:$0xff]   ;;  %v1629_v31 = vld [vmem:[#allocation6 + $0x90] ss:$12 sps:$4 sm:$0xff]  }
  0x73   : > { %1438 = vmatprep.subr.bf16.mxu1 %v1846_v4  ;;  %510 = vmatprep.subr.bf16.mxu0 %v1611_v17  ;;  %v1630_v32 = vld [vmem:[#allocation6 + $0x98] ss:$12 sps:$4 sm:$0xff]   ;;  %v1633_v34 = vld [vmem:[#allocation6 + $0xa8] ss:$12 sps:$4 sm:$0xff]   ;;  %v1634_v35 = vld [vmem:[#allocation6 + $0xb0] ss:$12 sps:$4 sm:$0xff]  }
  0x74   : > { %v1631_v33 = vld [vmem:[#allocation6 + $0xac] ss:$12 sps:$4 sm:$0xff]   ;;  %v1350_v44 = vld [vmem:[%s2253_s1] ss:$0 sm:$0xff]  ;;  %vm640_vm2 = vcmask 130048   ;;  %s1849_s18 = smov 96  }
  0x75   : > { %v1351_v48 = vld [vmem:[%s2254_s2] ss:$0 sm:$0xff]  ;;  %s1850_s19 = smov 64   ;;  %s1851_s15 = smov 32   ;;  %vm843_vm3 = vcmask 523520   ;;  %vm975_vm4 = vcmask 785920  }
  0x76   : > { %511 = vmatpush1.bf16.msra.mxu0 %v1613_v18  ;;  %1439 = vmatpush3.bf16.msra.mxu1 %v1614_v19  ;;  %vm1107_vm5 = vcmask 1048320   ;;  %s298_s20 = scalar_lea.vmem [#allocation9], %s1346_s10  ;;  %s1399_s14 = sshll.u32 %s1911_s25, 8 }
  0x77   : > { %1440 = vmatprep.subr.bf16.mxu1 %v1846_v4  ;;  %512 = vmatprep.subr.bf16.mxu0 %v1615_v20  ;;  %s1245_s9 = sshll.u32 %s298_s20, 4  ;;  %s2208_s10 = scalar_lea.hbm %s2258_s6, %s1399_s14  ;;  %s2202_s9 = int_to_ptr.vmem [resolvable:$true] %s1245_s9 }
  0x78   : > { %s1232_s29 = scalar_lea.sflag [#allocation5], %s2062_s13  ;;  %s1765_s25 = scalar_lea.vmem %s2202_s9, 256 }
  0x79   : > { %p1766_p11 = scmp.ne.s32.totalorder %s2202_s9, %s1765_s25  ;;  %p2272_p0 = scmp.ne.s32.totalorder %s2267_s12, 0 }
  0x7a   : > { %513 = vmatpush1.bf16.msra.mxu0 %v1617_v21  ;;  %1441 = vmatpush3.bf16.msra.mxu1 %v1618_v22  ;;  %s1852_s16 = smov [#allocation9]  }
  0x7b   : > { %1442 = vmatprep.subr.bf16.mxu1 %v1846_v4  ;;  %514 = vmatprep.subr.bf16.mxu0 %v1619_v23  ;;  %p1767_p1 = pnand %p1766_p11, %p2272_p0  ;;  %s1769_s17 = sshll.u32 %s1852_s16, 4  ;;  %s1770_s17 = int_to_ptr.vmem [resolvable:$false] %s1769_s17 }
  0x7c   : > { %p1772_p5 = scmp.lt.s32.totalorder %s2202_s9, %s1770_s17 }
  0x7d   : > { %p1768_p3 = pneg %p1767_p1 }
  0x7e   : > { %515 = vmatpush1.bf16.msra.mxu0 %v1621_v24  ;;  %1443 = vmatpush3.bf16.msra.mxu1 %v1622_v25 }
  0x7f   : > { %516 = vmatprep.subr.bf16.mxu0 %v1623_v26  ;;  %1444 = vmatprep.subr.bf16.mxu1 %v1846_v4 }
  0x82   : > { %517 = vmatpush1.bf16.msra.mxu0 %v1625_v27  ;;  %1445 = vmatpush3.bf16.msra.mxu1 %v1626_v28 }
  0x83   : > { %518 = vmatprep.subr.bf16.mxu0 %v1627_v29  ;;  %1446 = vmatprep.subr.bf16.mxu1 %v1846_v4 }
  0x86   : > { %519 = vmatpush1.bf16.msra.mxu0 %v1629_v31  ;;  %1447 = vmatpush3.bf16.msra.mxu1 %v1630_v32 }
  0x87   : > { %520 = vmatprep.subr.bf16.mxu0 %v1631_v33  ;;  %1448 = vmatprep.subr.bf16.mxu1 %v1846_v4 }
  0x8a   : > { %521 = vmatpush1.bf16.msra.mxu0 %v1633_v34  ;;  %1449 = vmatpush3.bf16.msra.mxu1 %v1634_v35 }
  0x8b   : > { %1454 = vmatprep.subr.bf16.mxu1 %v1846_v4  ;;  %1478 = vmatprep.subr.bf16.mxu0 %v1846_v4 }
  0xf9   : > { %v307_v7 = vpop.xlane.xlu0 %306 }
  0xfa   : > { %v311_v8 = vmul.f32 0.0078125, %v307_v7 }
  0xfc   : > { %v2085_v9 = vsub.f32 %v2076_v0, %v311_v8 }
  0xfd   : > { %v309_v10 = vpop.xlane.xlu0 %308 }
  0xfe   : > { %v312_v11 = vmul.f32 0.0078125, %v309_v10  ;;  %v315_v12 = vmul.f32 %v2085_v9, %v2085_v9 }
 0x100   : > { %v2090_v13 = vsub.f32 %v2078_v1, %v312_v11  ;;  %317 = vadd.xlane.f32.xlu1 %v315_v12 }
 0x102   : > { %v316_v14 = vmul.f32 %v2090_v13, %v2090_v13 }
 0x104   : > { %319 = vadd.xlane.f32.xlu1 %v316_v14 }
 0x18d   : > { %v318_v36 = vpop.xlane.xlu1 %317 }
 0x18e   : > { %v321_v37 = vmul.f32 0.0078125, %v318_v36 }
 0x190   : > { %v323_v38 = vadd.f32 1e-05, %v321_v37 }
 0x191   : > { %v320_v39 = vpop.xlane.xlu1 %319 }
 0x192   : > { %1643 = vrsqrt.f32 %v323_v38  ;;  %v322_v40 = vmul.f32 0.0078125, %v320_v39 }
 0x194   : > { %v324_v41 = vadd.f32 1e-05, %v322_v40 }
 0x196   : > { %1645 = vrsqrt.f32 %v324_v41 }
 0x19c   : > { %v1644_v42 = vpop.eup %1643 }
 0x19d   : > { %v327_v43 = vmul.f32 %v1644_v42, %v2085_v9 }
 0x19f   : > { %v335_v47 = vmul.f32 %v1350_v44, %v327_v43 }
 0x1a0   : > { %v1646_v45 = vpop.eup %1645 }
 0x1a1   : > { %v328_v46 = vmul.f32 %v1646_v45, %v2090_v13  ;;  %v343_v50 = vadd.f32 %v1351_v48, %v335_v47 }
 0x1a3   : > { %v336_v49 = vmul.f32 %v1350_v44, %v328_v46 }
 0x1a5   : > { %v344_v51 = vadd.f32 %v1351_v48, %v336_v49 }
 0x1a7   : > { %v345_v52 = vpack.c.bf16 %v344_v51, %v343_v50 }
 0x1a9   : > { %539 = vmatmul.mubr.bf16.vlgmr.msra.gmra.mrb[0].mxu0 %v345_v52  ;;  %1451 = vmatmul.mubr.bf16.vlgmr.msra.gmra.mrb[0].mxu1 %v345_v52 }
 0x1aa   : > { %1456 = vmatprep.mubr.msk.bf16.mxu1 %vm1848_vm0, %v1846_v4  ;;  %1480 = vmatprep.mubr.msk.bf16.mxu0 %vm1848_vm0, %v1846_v4 }
 0x27c   : > { %v540_v53 = vpop.f32.mrb[0].mxu0  ;;  %v583_v54 = vpop.f32.mrb[0].mxu1 }
 0x27d   : > { %v542_v55 = vpop.f32.mrb[1].mxu0  ;;  %v1452_v56 = vpop.f32.mrb[1].mxu1 }
 0x27e   : > { %v544_v57 = vpop.f32.mrb[2].mxu0  ;;  %v586_v58 = vpop.f32.mrb[2].mxu1 }
 0x27f   : > { %v590_v59 = vpack.c.bf16 %v544_v57, %v540_v53  ;;  %v2116_v60 = vpack.c.bf16 %v586_v58, %v583_v54  ;;  %v546_v61 = vpop.f32.mrb[3].mxu0  ;;  %v1453_v62 = vpop.f32.mrb[3].mxu1 }
 0x280   : > { %v591_v63 = vpack.c.bf16 %v546_v61, %v542_v55 }
 0x282   : > { %v597_v2 = vsel %vm592_vm1, %v591_v63, 0 }
 0x283   : > { %1455 = vmatpush3.bf16.xpose.msra.mxu1 %v597_v2 }
 0x284   : > { %1460 = vmatprep.subr.bf16.mxu1 %v1846_v4 }
 0x28a   : > { %1457 = vmatmul.mubr.msk.bf16.vlgmr.msra.gmra.mrb[4].mxu1 %vm592_vm1, %v590_v59 }
 0x28b   : > { %1461 = vmatpush3.bf16.msra.mxu1 %v2116_v60  ;;  %1462 = vmatprep.mubr.msk.bf16.mxu1 %vm1848_vm0, %v1846_v4 }
 0x28c   : > { %1466 = vmatprep.subr.bf16.mxu1 %v1846_v4 }
 0x35d   : > { %v633_v3 = vpop.f32.mrb[4].mxu1 }
 0x35e   : > { %v1458_v5 = vpop.f32.mrb[5].mxu1  ;;  %v641_v6 = vsel %vm640_vm2, %v633_v3, -inf }
 0x35f   : > { %642 = vmax.xlane.f32.xlu0 %v641_v6  ;;  %v636_v7 = vpop.f32.mrb[6].mxu1 }
 0x360   : > { %v1459_v8 = vpop.f32.mrb[7].mxu1  ;;  %v644_v9 = vsel %vm640_vm2, %v636_v7, -inf }
 0x361   : > { %645 = vmax.xlane.f32.xlu1 %v644_v9 }
 0x3ec   : > { %v643_v10 = vpop.xlane.xlu0 %642 }
 0x3ed   : > { %v647_v11 = vsub.f32 %v633_v3, %v643_v10 }
 0x3ee   : > { %v646_v12 = vpop.xlane.xlu1 %645 }
 0x3ef   : > { %v649_v13 = vmul.f32 1.442695, %v647_v11  ;;  %v648_v14 = vsub.f32 %v636_v7, %v646_v12 }
 0x3f1   : > { %1647 = vpow2.f32 %v649_v13  ;;  %v651_v15 = vmul.f32 1.442695, %v648_v14 }
 0x3f3   : > { %1649 = vpow2.f32 %v651_v15 }
 0x3fb   : > { %v1648_v16 = vpop.eup %1647 }
 0x3fc   : > { %v653_v17 = vsel %vm640_vm2, %v1648_v16, 0.0 }
 0x3fd   : > { %v1650_v18 = vpop.eup %1649  ;;  %654 = vadd.xlane.f32.xlu0 %v653_v17 }
 0x3fe   : > { %v656_v19 = vsel %vm640_vm2, %v1650_v18, 0.0 }
 0x3ff   : > { %657 = vadd.xlane.f32.xlu1 %v656_v19 }
 0x410   : > { %712 = vrot.lane.b32.xlu1 %v590_v59, %s1849_s18 }
 0x413   : > { %715 = vrot.lane.b32.xlu0 %v591_v63, %s1849_s18 }
 0x414   : > { %848 = vrot.lane.b32.xlu1 %v591_v63, %s1850_s19 }
 0x417   : > { %980 = vrot.lane.b32.xlu0 %v591_v63, %s1851_s15 }
 0x418   : > { %846 = vrot.lane.b32.xlu1 %v590_v59, %s1850_s19 }
 0x41c   : > { %978 = vrot.lane.b32.xlu1 %v590_v59, %s1851_s15 }
 0x48a   : > { %v655_v20 = vpop.xlane.xlu0 %654 }
 0x48b   : > { %1651 = vrcp.f32 %v655_v20 }
 0x48c   : > { %v658_v21 = vpop.xlane.xlu1 %657 }
 0x48d   : > { %1653 = vrcp.f32 %v658_v21 }
 0x48e   : > { %v716_v23 = vpop.permute.xlu0 %715 }
 0x48f   : > { %v721_v32 = vsel %vm592_vm1, %v716_v23, 0 }
 0x490   : > { %v713_v22 = vpop.permute.xlu1 %712 }
 0x492   : > { %v981_v30 = vpop.permute.xlu0 %980 }
 0x493   : > { %v986_v34 = vsel %vm592_vm1, %v981_v30, 0 }
 0x494   : > { %v849_v24 = vpop.permute.xlu1 %848 }
 0x495   : > { %v1652_v25 = vpop.eup %1651  ;;  %v854_v26 = vsel %vm592_vm1, %v849_v24, 0 }
 0x496   : > { %1479 = vmatpush3.bf16.xpose.msra.mxu0 %v854_v26  ;;  %v660_v28 = vmul.f32 %v1652_v25, %v1648_v16 }
 0x497   : > { %v1654_v27 = vpop.eup %1653  ;;  %1490 = vmatprep.subr.bf16.mxu0 %v1846_v4 }
 0x498   : > { %v662_v29 = vmul.f32 %v1654_v27, %v1650_v18  ;;  %v847_v33 = vpop.permute.xlu1 %846 }
 0x49a   : > { %v663_v31 = vpack.c.bf16 %v662_v29, %v660_v28 }
 0x49c   : > { %1463 = vmatmul.mubr.msk.bf16.vlgmr.msra.gmra.mrb[8].mxu1 %vm640_vm2, %v663_v31  ;;  %v979_v35 = vpop.permute.xlu1 %978 }
 0x49d   : > { %1467 = vmatpush3.bf16.xpose.msra.mxu1 %v721_v32  ;;  %1481 = vmatmul.mubr.msk.bf16.vlgmr.msra.gmra.mrb[4].mxu0 %vm592_vm1, %v847_v33 }
 0x49e   : > { %1491 = vmatpush3.bf16.xpose.msra.mxu0 %v986_v34  ;;  %1468 = vmatprep.mubr.msk.bf16.mxu1 %vm1848_vm0, %v1846_v4 }
 0x49f   : > { %1492 = vmatprep.mubr.msk.bf16.mxu0 %vm1848_vm0, %v1846_v4  ;;  %1472 = vmatprep.subr.bf16.mxu1 %v1846_v4 }
 0x4a0   : > { %1502 = vmatprep.subr.bf16.mxu0 %v1846_v4 }
 0x4a4   : > { %1469 = vmatmul.mubr.msk.bf16.vlgmr.msra.gmra.mrb[12].mxu1 %vm592_vm1, %v713_v22 }
 0x4a5   : > { %1493 = vmatmul.mubr.msk.bf16.vlgmr.msra.gmra.mrb[8].mxu0 %vm592_vm1, %v979_v35  ;;  %1474 = vmatprep.mubr.msk.bf16.mxu1 %vm1848_vm0, %v1846_v4 }
 0x4a6   : > { %1518 = vmatprep.mubr.msk.bf16.mxu0 %vm1848_vm0, %v1846_v4 }
 0x56f   : > { %v702_v36 = vpop.f32.mrb[8].mxu1 }
 0x570   : > { %709 = vst.msk [vmem:[#allocation2] sm:$0xff] %vm592_vm1, %v702_v36  ;;  %v1464_v37 = vpop.f32.mrb[9].mxu1  ;;  %v890_v38 = vpop.f32.mrb[4].mxu0 }
 0x571   : > { %v705_v39 = vpop.f32.mrb[10].mxu1  ;;  %v1482_v40 = vpop.f32.mrb[5].mxu0  ;;  %v897_v54 = vsel %vm640_vm2, %v890_v38, -inf }
 0x572   : > { %710 = vst.msk [vmem:[#allocation2 + $0x8] sm:$0xff] %vm592_vm1, %v705_v39  ;;  %v1465_v41 = vpop.f32.mrb[11].mxu1  ;;  %v893_v42 = vpop.f32.mrb[6].mxu0 }
 0x573   : > { %v1483_v43 = vpop.f32.mrb[7].mxu0  ;;  %v900_v56 = vsel %vm640_vm2, %v893_v42, -inf }
 0x577   : > { %v757_v44 = vpop.f32.mrb[12].mxu1 }
 0x578   : > { %v1470_v45 = vpop.f32.mrb[13].mxu1  ;;  %v1022_v46 = vpop.f32.mrb[8].mxu0  ;;  %v764_v47 = vsel %vm640_vm2, %v757_v44, -inf }
 0x579   : > { %v1494_v48 = vpop.f32.mrb[9].mxu0  ;;  %765 = vmax.xlane.f32.xlu0 %v764_v47  ;;  %v760_v49 = vpop.f32.mrb[14].mxu1  ;;  %v1029_v57 = vsel %vm640_vm2, %v1022_v46, -inf }
 0x57a   : > { %v1471_v50 = vpop.f32.mrb[15].mxu1  ;;  %v1025_v51 = vpop.f32.mrb[10].mxu0  ;;  %v767_v52 = vsel %vm640_vm2, %v760_v49, -inf }
 0x57b   : > { %v1495_v53 = vpop.f32.mrb[11].mxu0  ;;  %768 = vmax.xlane.f32.xlu1 %v767_v52  ;;  %v1032_v55 = vsel %vm640_vm2, %v1025_v51, -inf  ;;  %v1636_v52 = vld [vmem:[#allocation8 + $0x8] sm:$0xff]  }
 0x57c   : > { %v1637_v53 = vld [vmem:[#allocation8 + $0x10] sm:$0xff]  }
 0x57d   : > { %898 = vmax.xlane.f32.xlu0 %v897_v54  ;;  %v1638_v54 = vld [vmem:[#allocation8 + $0x18] sm:$0xff]  }
 0x57f   : > { %1033 = vmax.xlane.f32.xlu1 %v1032_v55  ;;  %v1639_v55 = vld [vmem:[#allocation8 + $0x20] sm:$0xff]  }
 0x581   : > { %901 = vmax.xlane.f32.xlu0 %v900_v56 }
 0x585   : > { %1030 = vmax.xlane.f32.xlu0 %v1029_v57 }
 0x606   : > { %v766_v58 = vpop.xlane.xlu0 %765 }
 0x607   : > { %v770_v7 = vsub.f32 %v757_v44, %v766_v58 }
 0x608   : > { %v769_v59 = vpop.xlane.xlu1 %768 }
 0x609   : > { %v771_v8 = vsub.f32 %v760_v49, %v769_v59  ;;  %v772_v13 = vmul.f32 1.442695, %v770_v7 }
 0x60a   : > { %v899_v61 = vpop.xlane.xlu0 %898 }
 0x60b   : > { %v903_v62 = vsub.f32 %v890_v38, %v899_v61  ;;  %v774_v14 = vmul.f32 1.442695, %v771_v8  ;;  %v1640_v61 = vld [vmem:[#allocation8 + $0x28] sm:$0xff]  }
 0x60c   : > { %v1034_v63 = vpop.xlane.xlu1 %1033 }
 0x60d   : > { %v905_v2 = vmul.f32 1.442695, %v903_v62  ;;  %v1036_v3 = vsub.f32 %v1025_v51, %v1034_v63  ;;  %v1635_v51 = vld [vmem:[#allocation8] sm:$0xff]   ;;  %v1641_v62 = vld [vmem:[#allocation8 + $0x30] sm:$0xff]  }
 0x60e   : > { %v902_v5 = vpop.xlane.xlu0 %901  ;;  %1503 = vmatpush3.bf16.msra.mxu0 %v1635_v51 }
 0x60f   : > { %1655 = vpow2.f32 %v905_v2  ;;  %v904_v6 = vsub.f32 %v893_v42, %v902_v5  ;;  %v1039_v9 = vmul.f32 1.442695, %v1036_v3  ;;  %1504 = vmatprep.subr.bf16.mxu0 %v1846_v4  ;;  %v1642_v5 = vld [vmem:[#allocation8 + $0x38] sm:$0xff]  }
 0x611   : > { %v907_v10 = vmul.f32 1.442695, %v904_v6 }
 0x612   : > { %v1031_v11 = vpop.xlane.xlu0 %1030  ;;  %1505 = vmatpush3.bf16.msra.mxu0 %v1636_v52 }
 0x613   : > { %1657 = vpow2.f32 %v907_v10  ;;  %v1035_v12 = vsub.f32 %v1022_v46, %v1031_v11  ;;  %1506 = vmatprep.subr.bf16.mxu0 %v1846_v4 }
 0x614   : > { %1659 = vpow2.f32 %v1039_v9 }
 0x615   : > { %v1037_v15 = vmul.f32 1.442695, %v1035_v12 }
 0x616   : > { %1507 = vmatpush3.bf16.msra.mxu0 %v1637_v53 }
 0x617   : > { %1661 = vpow2.f32 %v1037_v15  ;;  %1508 = vmatprep.subr.bf16.mxu0 %v1846_v4 }
 0x618   : > { %1663 = vpow2.f32 %v772_v13 }
 0x619   : > { %v1656_v16 = vpop.eup %1655  ;;  %1665 = vpow2.f32 %v774_v14 }
 0x61a   : > { %v909_v17 = vsel %vm640_vm2, %v1656_v16, 0.0  ;;  %1509 = vmatpush3.bf16.msra.mxu0 %v1638_v54 }
 0x61b   : > { %910 = vadd.xlane.f32.xlu0 %v909_v17  ;;  %1510 = vmatprep.subr.bf16.mxu0 %v1846_v4 }
 0x61d   : > { %v1658_v18 = vpop.eup %1657 }
 0x61e   : > { %v912_v19 = vsel %vm640_vm2, %v1658_v18, 0.0  ;;  %v1660_v20 = vpop.eup %1659  ;;  %1511 = vmatpush3.bf16.msra.mxu0 %v1639_v55 }
 0x61f   : > { %913 = vadd.xlane.f32.xlu1 %v912_v19  ;;  %v1044_v24 = vsel %vm640_vm2, %v1660_v20, 0.0  ;;  %1512 = vmatprep.subr.bf16.mxu0 %v1846_v4 }
 0x621   : > { %v1662_v21 = vpop.eup %1661 }
 0x622   : > { %v1664_v22 = vpop.eup %1663  ;;  %v1041_v23 = vsel %vm640_vm2, %v1662_v21, 0.0  ;;  %1513 = vmatpush3.bf16.msra.mxu0 %v1640_v61 }
 0x623   : > { %v1666_v25 = vpop.eup %1665  ;;  %1042 = vadd.xlane.f32.xlu0 %v1041_v23  ;;  %1045 = vadd.xlane.f32.xlu1 %v1044_v24  ;;  %v776_v26 = vsel %vm640_vm2, %v1664_v22, 0.0 }
 0x624   : > { %v779_v27 = vsel %vm640_vm2, %v1666_v25, 0.0  ;;  %1514 = vmatprep.subr.bf16.mxu0 %v1846_v4 }
 0x626   : > { %1515 = vmatpush3.bf16.msra.mxu0 %v1641_v62 }
 0x627   : > { %777 = vadd.xlane.f32.xlu0 %v776_v26  ;;  %780 = vadd.xlane.f32.xlu1 %v779_v27 }
 0x628   : > { %1516 = vmatprep.subr.bf16.mxu0 %v1846_v4 }
 0x62a   : > { %1517 = vmatpush3.bf16.msra.mxu0 %v1642_v5 }
 0x638   : > { %920 = vrot.lane.b32.xlu1 %v2116_v60, %s1850_s19 }
 0x63c   : > { %1052 = vrot.lane.b32.xlu1 %v2116_v60, %s1851_s15 }
 0x63d   : > { %788 = vrot.lane.b32.xlu0 %v2116_v60, %s1849_s18 }
 0x6a8   : > { %v911_v28 = vpop.xlane.xlu0 %910 }
 0x6ac   : > { %v914_v29 = vpop.xlane.xlu1 %913 }
 0x6b0   : > { %v1043_v30 = vpop.xlane.xlu0 %1042  ;;  %v1046_v31 = vpop.xlane.xlu1 %1045 }
 0x6b4   : > { %v778_v32 = vpop.xlane.xlu0 %777  ;;  %v781_v33 = vpop.xlane.xlu1 %780 }
 0x6b5   : > { %1667 = vrcp.f32 %v778_v32 }
 0x6b6   : > { %1669 = vrcp.f32 %v781_v33 }
 0x6b7   : > { %1671 = vrcp.f32 %v914_v29 }
 0x6b8   : > { %v789_v34 = vpop.permute.xlu0 %788  ;;  %1673 = vrcp.f32 %v911_v28  ;;  %v921_v40 = vpop.permute.xlu1 %920 }
 0x6b9   : > { %1473 = vmatpush3.bf16.msra.mxu1 %v789_v34  ;;  %1675 = vrcp.f32 %v1043_v30 }
 0x6ba   : > { %1484 = vmatprep.subr.bf16.mxu1 %v1846_v4  ;;  %1677 = vrcp.f32 %v1046_v31 }
 0x6bc   : > { %v1053_v47 = vpop.permute.xlu1 %1052 }
 0x6bf   : > { %v1668_v35 = vpop.eup %1667 }
 0x6c0   : > { %v1670_v36 = vpop.eup %1669  ;;  %v783_v37 = vmul.f32 %v1668_v35, %v1664_v22 }
 0x6c1   : > { %v785_v38 = vmul.f32 %v1670_v36, %v1666_v25  ;;  %v1672_v39 = vpop.eup %1671 }
 0x6c2   : > { %v1674_v41 = vpop.eup %1673  ;;  %v918_v42 = vmul.f32 %v1672_v39, %v1658_v18 }
 0x6c3   : > { %v786_v60 = vpack.c.bf16 %v785_v38, %v783_v37  ;;  %v916_v43 = vmul.f32 %v1674_v41, %v1656_v16  ;;  %v1676_v44 = vpop.eup %1675 }
 0x6c4   : > { %v1678_v46 = vpop.eup %1677  ;;  %v1048_v48 = vmul.f32 %v1676_v44, %v1662_v21 }
 0x6c5   : > { %1475 = vmatmul.mubr.msk.bf16.vlgmr.msra.gmra.mrb[16].mxu1 %vm640_vm2, %v786_v60  ;;  %v919_v45 = vpack.c.bf16 %v918_v42, %v916_v43  ;;  %v1050_v49 = vmul.f32 %v1678_v46, %v1660_v20  ;;  %v1392_v20 = vld [vmem:[%s2257_s5] ss:$0 sm:$0xff] }
 0x6c6   : > { %1485 = vmatpush3.bf16.msra.mxu1 %v921_v40  ;;  %1486 = vmatprep.mubr.msk.bf16.mxu1 %vm1848_vm0, %v1846_v4 }
 0x6c7   : > { %1496 = vmatprep.subr.bf16.mxu1 %v1846_v4  ;;  %v1051_v50 = vpack.c.bf16 %v1050_v49, %v1048_v48 }
 0x6cd   : > { %1487 = vmatmul.mubr.msk.bf16.vlgmr.msra.gmra.mrb[20].mxu1 %vm640_vm2, %v919_v45 }
 0x6ce   : > { %1497 = vmatpush3.bf16.msra.mxu1 %v1053_v47  ;;  %1498 = vmatprep.mubr.msk.bf16.mxu1 %vm1848_vm0, %v1846_v4 }
 0x6d5   : > { %1499 = vmatmul.mubr.msk.bf16.vlgmr.msra.gmra.mrb[24].mxu1 %vm640_vm2, %v1051_v50 }
 0x798   : > { %v828_v56 = vpop.f32.mrb[16].mxu1 }
 0x799   : > { %837 = vrot.lane.b32.xlu1 %v828_v56, %s1851_s15  ;;  %v1476_v57 = vpop.f32.mrb[17].mxu1 }
 0x79a   : > { %v831_v58 = vpop.f32.mrb[18].mxu1 }
 0x79b   : > { %839 = vrot.lane.b32.xlu0 %v831_v58, %s1851_s15  ;;  %v1477_v59 = vpop.f32.mrb[19].mxu1 }
 0x7a0   : > { %v960_v63 = vpop.f32.mrb[20].mxu1 }
 0x7a1   : > { %969 = vrot.lane.b32.xlu1 %v960_v63, %s1850_s19  ;;  %v1488_v2 = vpop.f32.mrb[21].mxu1 }
 0x7a2   : > { %v963_v3 = vpop.f32.mrb[22].mxu1 }
 0x7a3   : > { %971 = vrot.lane.b32.xlu0 %v963_v3, %s1850_s19  ;;  %v1489_v6 = vpop.f32.mrb[23].mxu1 }
 0x7a8   : > { %v1092_v7 = vpop.f32.mrb[24].mxu1 }
 0x7a9   : > { %1101 = vrot.lane.b32.xlu1 %v1092_v7, %s1849_s18  ;;  %v1500_v8 = vpop.f32.mrb[25].mxu1 }
 0x7aa   : > { %v1095_v9 = vpop.f32.mrb[26].mxu1 }
 0x7ab   : > { %1103 = vrot.lane.b32.xlu0 %v1095_v9, %s1849_s18  ;;  %v1501_v10 = vpop.f32.mrb[27].mxu1  ;;  %s1771_s18 = scalar_lea.vmem %s1770_s17, 512 }
 0x7ac   : > { %p1773_p9 = scmp.lt.s32.totalorder %s1771_s18, %s1765_s25 }
 0x7ae   : > { %p1774_p12 = por %p1773_p9, %p1772_p5 }
 0x7b0   : > { %p1775_p2 = pnand %p1774_p12, %p1768_p3 }
 0x80b   : > { %v838_v11 = vpop.permute.xlu1 %837 }
 0x80c   : > { %844 = vst.msk [vmem:[#allocation2] sm:$0xff] %vm843_vm3, %v838_v11 }
 0x80d   : > { %v840_v12 = vpop.permute.xlu0 %839 }
 0x80e   : > { %845 = vst.msk [vmem:[#allocation2 + $0x8] sm:$0xff] %vm843_vm3, %v840_v12 }
 0x813   : > { %v970_v13 = vpop.permute.xlu1 %969 }
 0x814   : > { %976 = vst.msk [vmem:[#allocation2] sm:$0xff] %vm975_vm4, %v970_v13 }
 0x815   : > { %v972_v14 = vpop.permute.xlu0 %971 }
 0x816   : > { %977 = vst.msk [vmem:[#allocation2 + $0x8] sm:$0xff] %vm975_vm4, %v972_v14 }
 0x81b   : > { %v1102_v4 = vpop.permute.xlu1 %1101 }
 0x81c   : > { %1108 = vst.msk [vmem:[#allocation2] sm:$0xff] %vm1107_vm5, %v1102_v4 }
 0x81d   : > { %v1104_v15 = vpop.permute.xlu0 %1103 }
 0x81e   : > { %1109 = vst.msk [vmem:[#allocation2 + $0x8] sm:$0xff] %vm1107_vm5, %v1104_v15 }
 0x823   : > { %v1110_v16 = vld [vmem:[#allocation2] sm:$0xff] }
 0x825   : > { %v1111_v17 = vld [vmem:[#allocation2 + $0x8] sm:$0xff] }
 0x826   : > { %v1112_v18 = vpack.c.bf16 %v1111_v17, %v1110_v16 }
 0x828   : > { %1519 = vmatmul.mubr.bf16.vlgmr.msra.gmra.mrb[12].mxu0 %v1112_v18 }
 0x8fb   : > { %v1211_v19 = vpop.f32.mrb[12].mxu0 }
 0x8fc   : > { %v1218_v21 = vadd.f32 %v1211_v19, %v2076_v0  ;;  %v1520_v22 = vpop.f32.mrb[13].mxu0 }
 0x8fd   : > { %v1214_v23 = vpop.f32.mrb[14].mxu0 }
 0x8fe   : > { %v1227_v24 = vadd.f32 %v1392_v20, %v1218_v21  ;;  %v1219_v25 = vadd.f32 %v1214_v23, %v2078_v1  ;;  %v1521_v26 = vpop.f32.mrb[15].mxu0 }
 0x900   : > { %1229 = vst [vmem:[%s298_s20] sm:$0xff] %v1227_v24  ;;  %v1228_v27 = vadd.f32 %v1392_v20, %v1219_v25 }
 0x902   : > { %1230 = vst [vmem:[%s298_s20 + $0x8] sm:$0xff] %v1228_v27 }
 0x903   : > { %1778 = shalt.err (!%p1775_p2)
}
 0x904   : > { %s1779_s19 = scalar_lea.hbm %s2208_s10, 256  ;;  %s1783_s30 = scalar_lea.hbm %s2258_s6, 512 }
 0x905   : > { %p1780_p13 = scmp.ne.s32.totalorder %s2208_s10, %s1779_s19  ;;  %p1784_p4 = scmp.lt.u32.totalorder %s2208_s10, %s2258_s6 }
 0x906   : > { %p1785_p7 = scmp.lt.u32.totalorder %s1783_s30, %s1779_s19  ;;  %p1787_p11 = scmp.lt.u32.totalorder %s1779_s19, %s2208_s10 }
 0x907   : > { %p1781_p6 = pnand %p1780_p13, %p2272_p0 }
 0x908   : > { %p1786_p8 = por %p1785_p7, %p1784_p4 }
 0x909   : > { %p1782_p10 = pneg %p1781_p6 }
 0x90a   : > { %p1788_p1 = por %p1787_p11, %p1786_p8 }
 0x90c   : > { %p1789_p3 = pnand %p1788_p1, %p1782_p10 }
 0x90e   : > { %1792 = shalt.err (!%p1789_p3)
}
 0x90f   : > { %s1853_s8 = smov 128   ;;  %s1854_s27 = smov 8  }
 0x910   : > { %1532 = dma.vmem_to_hbm [thread:$0]  (%p2272_p0), %s2202_s9, 256, %s2208_s10, %s1232_s29, %s1853_s8, %s1853_s8, %s1854_s27  }
 0x911 PF: > { %s1260_s25 = sand.u32 1, %s1823_s21   ;;  %p2273_p5 = scmp.ne.s32.totalorder %s2263_s28, 0 }
 0x912   : > { %p2274_p9 = scmp.ge.s32.totalorder %s1835_s24, 2  ;;  %s1261_s16 = scalar_lea.sflag [#allocation5], %s1260_s25 }
 0x914   : > { %p1546_p12 = pnand %p2274_p9, %p2273_p5 }
 0x916   : > { %1818 = dma.done.wait (!%p1546_p12), %s1261_s16, 256  }
 0x917   : > { %1820 = vsyncadd (!%p1546_p12), %s1261_s16, 4294967040  ;;  %p20_p2 = scmp.ge.s32.totalorder %s2000_s26, 4   ;;  %s2275_s21 = smov %s1827_s22 }
 0x918   : > { %s2276_s22 = smov %s1831_s23  ;;  %s2277_s23 = smov %s2009_s11 }
 0x919   : > { %s2278_s24 = smov %s2000_s26  ;;  %22 = sbr.rel (!%p20_p2) target bundleno = 6 (0x6), region = 97 }
 0x920   :  { %1266 = vsyncpa [#allocation4], 1 }
 0x921   :  { %1268 = vsyncpa [#allocation4 + $0x1], 1 }
 0x922   :  { %1269 = vsyncpa [#allocation7], 1 }
 0x923   :  { %1270 = vsyncpa [#allocation5], 1 }
 0x924   :  { %1272 = vsyncpa [#allocation5 + $0x1], 1 }

</bundles_post_ra>
